<compile_context>
chip_gen: v7x
topology: tpu7x:2x2x1
jax: 0.10.0
libtpu: 0.0.40
codegen_flags: <defaults>
</compile_context>

<pallas_src>
import functools
import math

import jax
import jax.numpy as jnp
from jax import lax
from jax.experimental import pallas as pl
from jax.experimental.pallas import tpu as pltpu

_LN_EPS = 1e-5
_HIGH = jax.lax.Precision.HIGHEST


# ---------------------------------------------------------------------------
# Tiling helper (byte-aware, per performance review)
# ---------------------------------------------------------------------------
def _row_tile(m, row_bytes, target_bytes=2 << 20):
    """Pick a row tile: one big block when the whole array is small (amortizes
    the ~0.35us/step grid overhead), otherwise the largest 8-aligned divisor
    that keeps a block around `target_bytes` (fits comfortably in scoped VMEM
    with double buffering on v5e/v6e/v7x)."""
    if m * row_bytes <= 2 * target_bytes:
        return m
    for t in (4096, 2048, 1024, 512, 256, 128, 64, 32, 16, 8):
        if m % t == 0 and t * row_bytes <= target_bytes:
            return t
    return m


# ---------------------------------------------------------------------------
# Kernels
# ---------------------------------------------------------------------------
def _linear_kernel(x_ref, w_ref, b_ref, o_ref, *, activation):
    # y = act(x @ W + b); whole N (lane-dense) output per tile.
    y = jnp.dot(x_ref[...], w_ref[...], preferred_element_type=jnp.float32)
    y = y + b_ref[...]
    if activation == "relu":
        y = jnp.maximum(y, 0.0)
    o_ref[...] = y.astype(o_ref.dtype)


def _layernorm_kernel(*refs, eps, with_residual):
    if with_residual:
        x_ref, r_ref, g_ref, b_ref, o_ref = refs
        y = x_ref[...].astype(jnp.float32) + r_ref[...].astype(jnp.float32)
    else:
        x_ref, g_ref, b_ref, o_ref = refs
        y = x_ref[...].astype(jnp.float32)
    mu = jnp.mean(y, axis=-1, keepdims=True)
    var = jnp.mean((y - mu) ** 2, axis=-1, keepdims=True)
    yn = (y - mu) * lax.rsqrt(var + eps)
    o_ref[...] = (yn * g_ref[...] + b_ref[...]).astype(o_ref.dtype)


def _attn_core_kernel(q_ref, k_ref, v_ref, mask_ref, o_ref, *, scale):
    # One (batch*head) slice per grid step: softmax(q k^T * scale + mask) v
    q = q_ref[0].astype(jnp.float32)          # (Lq, Dh)
    k = k_ref[0].astype(jnp.float32)          # (Lk, Dh)
    v = v_ref[0].astype(jnp.float32)          # (Lk, Dh)
    s = lax.dot_general(q, k, (((1,), (1,)), ((), ())),
                        preferred_element_type=jnp.float32) * scale
    s = s + mask_ref[...]                     # additive float mask (Lq, Lk)
    m = jnp.max(s, axis=-1, keepdims=True)
    p = jnp.exp(s - m)
    l = jnp.sum(p, axis=-1, keepdims=True)
    o = jnp.dot(p, v, preferred_element_type=jnp.float32) / l
    o_ref[0] = o.astype(o_ref.dtype)
    # TODO(synk): attention-weight dropout is identity in eval mode (omitted).


def _scale_add_pe_kernel(x_ref, pe_ref, o_ref, *, scale):
    # y = x * sqrt(model_dim) + pe  (pe broadcast over the batch axis)
    o_ref[...] = (x_ref[...] * scale + pe_ref[...][:, None, :]).astype(o_ref.dtype)
    # TODO(synk): training-mode dropout (pltpu.prng_*) omitted; identity in eval.


def _pool_head_kernel(x_ref, w_ref, b_ref, o_ref):
    # log_softmax( mean(x, axis=1) @ W + b )
    x = x_ref[...].astype(jnp.float32)                         # (L, B, D)
    xm = jnp.mean(x, axis=1)                                   # (L, D)
    y = jnp.dot(xm, w_ref[...], preferred_element_type=jnp.float32) + b_ref[...]
    m = jnp.max(y, axis=-1, keepdims=True)
    lse = m + jnp.log(jnp.sum(jnp.exp(y - m), axis=-1, keepdims=True))
    o_ref[...] = (y - lse).astype(o_ref.dtype)


# ---------------------------------------------------------------------------
# Pallas wrappers
# ---------------------------------------------------------------------------
def pallas_linear(x2d, lin, activation=None):
    m, k = x2d.shape
    n = lin["w"].shape[1]
    tm = _row_tile(m, 4 * (k + n))
    return pl.pallas_call(
        functools.partial(_linear_kernel, activation=activation),
        out_shape=jax.ShapeDtypeStruct((m, n), x2d.dtype),
        grid=(m // tm,),
        in_specs=[
            pl.BlockSpec((tm, k), lambda i: (i, 0)),
            pl.BlockSpec((k, n), lambda i: (0, 0)),   # weights resident across grid
            pl.BlockSpec((1, n), lambda i: (0, 0)),
        ],
        out_specs=pl.BlockSpec((tm, n), lambda i: (i, 0)),
        compiler_params=pltpu.CompilerParams(dimension_semantics=("parallel",)),
    )(x2d, lin["w"], lin["b"])


def pallas_layer_norm(x, ln, residual=None, eps=_LN_EPS):
    shape = x.shape
    d = shape[-1]
    x2 = x.reshape(-1, d)
    m = x2.shape[0]
    args = [x2]
    if residual is not None:
        args.append(residual.reshape(-1, d))
    args += [ln["g"], ln["b"]]
    tm = _row_tile(m, 4 * d * (3 if residual is not None else 2))
    n_tiled = 2 if residual is not None else 1
    in_specs = [pl.BlockSpec((tm, d), lambda i: (i, 0)) for _ in range(n_tiled)]
    in_specs += [pl.BlockSpec((1, d), lambda i: (0, 0)),
                 pl.BlockSpec((1, d), lambda i: (0, 0))]
    out = pl.pallas_call(
        functools.partial(_layernorm_kernel, eps=eps,
                          with_residual=residual is not None),
        out_shape=jax.ShapeDtypeStruct((m, d), x.dtype),
        grid=(m // tm,),
        in_specs=in_specs,
        out_specs=pl.BlockSpec((tm, d), lambda i: (i, 0)),
        compiler_params=pltpu.CompilerParams(dimension_semantics=("parallel",)),
    )(*args)
    return out.reshape(shape)


def pallas_attention_core(qh, kh, vh, mask, scale):
    bh, lq, dh = qh.shape
    lk = kh.shape[1]
    return pl.pallas_call(
        functools.partial(_attn_core_kernel, scale=float(scale)),
        out_shape=jax.ShapeDtypeStruct((bh, lq, dh), qh.dtype),
        grid=(bh,),
        in_specs=[
            pl.BlockSpec((1, lq, dh), lambda i: (i, 0, 0)),
            pl.BlockSpec((1, lk, dh), lambda i: (i, 0, 0)),
            pl.BlockSpec((1, lk, dh), lambda i: (i, 0, 0)),
            pl.BlockSpec((lq, lk), lambda i: (0, 0)),       # mask resident
        ],
        out_specs=pl.BlockSpec((1, lq, dh), lambda i: (i, 0, 0)),
        compiler_params=pltpu.CompilerParams(dimension_semantics=("parallel",)),
    )(qh, kh, vh, mask)


def pallas_scale_add_pe(x, pe_slice, scale):
    s, b, d = x.shape
    ts = _row_tile(s, 4 * (2 * b * d + d))
    return pl.pallas_call(
        functools.partial(_scale_add_pe_kernel, scale=float(scale)),
        out_shape=jax.ShapeDtypeStruct((s, b, d), x.dtype),
        grid=(s // ts,),
        in_specs=[
            pl.BlockSpec((ts, b, d), lambda i: (i, 0, 0)),
            pl.BlockSpec((ts, d), lambda i: (i, 0)),
        ],
        out_specs=pl.BlockSpec((ts, b, d), lambda i: (i, 0, 0)),
        compiler_params=pltpu.CompilerParams(dimension_semantics=("parallel",)),
        input_output_aliases={0: 0},   # overwrite x in place (pure elementwise pass)
    )(x, pe_slice)


def pallas_pool_head(x3, lin):
    l, b, d = x3.shape
    n = lin["w"].shape[1]
    return pl.pallas_call(
        _pool_head_kernel,
        out_shape=jax.ShapeDtypeStruct((l, n), x3.dtype),
        grid=(1,),
        in_specs=[
            pl.BlockSpec((l, b, d), lambda i: (0, 0, 0)),
            pl.BlockSpec((d, n), lambda i: (0, 0)),
            pl.BlockSpec((1, n), lambda i: (0, 0)),
        ],
        out_specs=pl.BlockSpec((l, n), lambda i: (0, 0)),
    )(x3, lin["w"], lin["b"])


# ---------------------------------------------------------------------------
# Model forward (eval mode; dropout = identity)
# ---------------------------------------------------------------------------
def pallas_mha(p, q, k, v, *, num_heads, mask=None):
    lq, b, d = q.shape
    lk = k.shape[0]
    dh = d // num_heads
    qp = pallas_linear(q.reshape(lq * b, d), p["wq"])
    kp = pallas_linear(k.reshape(lk * b, d), p["wk"])
    vp = pallas_linear(v.reshape(lk * b, d), p["wv"])

    def split_heads(x, L):
        return x.reshape(L, b, num_heads, dh).transpose(1, 2, 0, 3).reshape(
            b * num_heads, L, dh)

    qh, kh, vh = split_heads(qp, lq), split_heads(kp, lk), split_heads(vp, lk)
    if mask is None:
        mask = jnp.zeros((lq, lk), jnp.float32)
    oh = pallas_attention_core(qh, kh, vh, mask, 1.0 / math.sqrt(dh))
    o = oh.reshape(b, num_heads, lq, dh).transpose(2, 0, 1, 3).reshape(lq * b, d)
    return pallas_linear(o, p["wo"]).reshape(lq, b, d)


def pallas_feed_forward(p, x):
    shape = x.shape
    d = shape[-1]
    x2 = x.reshape(-1, d)
    h = pallas_linear(x2, p["fc1"], activation="relu")
    y = pallas_linear(h, p["fc2"])
    return pallas_layer_norm(y, p["ln"], residual=x2).reshape(shape)


def pallas_encoder(p, src, *, num_heads, mask):
    for lp in p["layers"]:
        attn = pallas_mha(lp["attn"], src, src, src, num_heads=num_heads, mask=mask)
        src = pallas_layer_norm(attn, lp["ln"], residual=src)
        src = pallas_feed_forward(lp["ffn"], src)
    return pallas_layer_norm(src, p["ln"])


def final_transformer_fwd(p, src_tok, pe_table, src_mask, *, num_heads):
    s, _ = src_tok.shape
    d = p["emb"].shape[1]
    # TODO(synk): embedding gather left to XLA (jnp.take); everything downstream is Pallas.
    embedded = jnp.take(p["emb"], src_tok, axis=0)                   # (S, B, D)
    # TODO(synk): original PyTorch reads embedded.size(2) before binding; use sqrt(model_dim).
    x = pallas_scale_add_pe(embedded, pe_table[:s], math.sqrt(d))
    enc = pallas_encoder(p["enc"], x, num_heads=num_heads, mask=src_mask)
    return pallas_pool_head(enc, p["fc_out"])                        # (S, model_dim) log-probs


def decoder_fwd(p, tgt, memory, tgt_mask, memory_mask, *, num_heads):
    for lp in p["layers"]:
        t2 = pallas_mha(lp["self_attn"], tgt, tgt, tgt,
                        num_heads=num_heads, mask=tgt_mask)
        tgt = pallas_layer_norm(t2, lp["ln"], residual=tgt)
        t2 = pallas_mha(lp["cross_attn"], tgt, memory, memory,
                        num_heads=num_heads, mask=memory_mask)
        tgt = pallas_layer_norm(t2, lp["ln"], residual=tgt)
        tgt = pallas_feed_forward(lp["ffn"], tgt)
    return pallas_layer_norm(tgt, p["ln"])


def full_seq2seq_fwd(params, src_tok, tgt, pe_table, src_mask=None,
                     tgt_mask=None, memory_mask=None, *, num_heads):
    memory2d = final_transformer_fwd(params["encoder"], src_tok, pe_table,
                                     src_mask, num_heads=num_heads)
    # TODO(synk): reference mixes batched tgt with unbatched memory (PyTorch would
    # error); broadcast memory across the batch so cross-attention is well defined.
    s = memory2d.shape[0]
    b = tgt.shape[1]
    memory = jnp.broadcast_to(memory2d[:, None, :], (s, b, memory2d.shape[1]))
    dec = decoder_fwd(params["decoder"], tgt, memory, tgt_mask, memory_mask,
                      num_heads=num_heads)
    return pallas_pool_head(dec, params["fc_out"])                   # (T, output_dim)


# ---------------------------------------------------------------------------
# Parameters / buffers
# ---------------------------------------------------------------------------
def make_positional_encoding_table(model_dim, max_len=10000, custom_scale_factor=1.0):
    assert model_dim % 2 == 0, "model_dim must be even for the sin/cos PE table"
    position = jnp.arange(max_len, dtype=jnp.float32)[:, None]
    div_term = jnp.exp(jnp.arange(0, model_dim, 2, dtype=jnp.float32)
                       * (-math.log(10000.0) / model_dim))
    angles = position * div_term * custom_scale_factor
    pe = jnp.zeros((max_len, model_dim), jnp.float32)
    pe = pe.at[:, 0::2].set(jnp.sin(angles))
    pe = pe.at[:, 1::2].set(jnp.cos(angles))
    return pe


def _init_linear(key, d_in, d_out, scale=0.05):
    kw, kb = jax.random.split(key)
    return {"w": jax.random.normal(kw, (d_in, d_out), jnp.float32) * scale,
            "b": jax.random.normal(kb, (1, d_out), jnp.float32) * scale}


def _init_ln(d):
    return {"g": jnp.ones((1, d), jnp.float32), "b": jnp.zeros((1, d), jnp.float32)}


def _init_mha(key, d):
    ks = jax.random.split(key, 4)
    return {"wq": _init_linear(ks[0], d, d), "wk": _init_linear(ks[1], d, d),
            "wv": _init_linear(ks[2], d, d), "wo": _init_linear(ks[3], d, d)}


def _init_ffn(key, d, f):
    k1, k2 = jax.random.split(key)
    return {"fc1": _init_linear(k1, d, f), "fc2": _init_linear(k2, f, d),
            "ln": _init_ln(d)}


def _init_enc_layer(key, d, f):
    k1, k2 = jax.random.split(key)
    return {"attn": _init_mha(k1, d), "ln": _init_ln(d), "ffn": _init_ffn(k2, d, f)}


def _init_dec_layer(key, d, f):
    k1, k2, k3 = jax.random.split(key, 3)
    return {"self_attn": _init_mha(k1, d), "cross_attn": _init_mha(k2, d),
            "ln": _init_ln(d), "ffn": _init_ffn(k3, d, f)}


def init_full_model(key, input_dim, output_dim, d, f, n_layers):
    k_emb, k_enc, k_encfc, k_dec, k_fc = jax.random.split(key, 5)
    enc_layers = [_init_enc_layer(k, d, f) for k in jax.random.split(k_enc, n_layers)]
    dec_layers = [_init_dec_layer(k, d, f) for k in jax.random.split(k_dec, n_layers)]
    return {
        "encoder": {
            "emb": jax.random.normal(k_emb, (input_dim, d), jnp.float32) * 0.1,
            "enc": {"layers": enc_layers, "ln": _init_ln(d)},
            "fc_out": _init_linear(k_encfc, d, d),
        },
        "decoder": {"layers": dec_layers, "ln": _init_ln(d)},
        "fc_out": _init_linear(k_fc, d, output_dim),
    }


def causal_mask(t):
    idx = jnp.arange(t)
    return jnp.where(idx[None, :] <= idx[:, None], 0.0, -1e9).astype(jnp.float32)


# ---------------------------------------------------------------------------
# Pure-JAX reference (same parameters) for correctness checking
# ---------------------------------------------------------------------------
def _rdot(a, b):
    return jnp.dot(a, b, precision=_HIGH)


def _ref_linear(x2, lin, act=None):
    y = _rdot(x2, lin["w"]) + lin["b"][0]
    return jnp.maximum(y, 0.0) if act == "relu" else y


def _ref_ln(p, y, eps=_LN_EPS):
    mu = y.mean(-1, keepdims=True)
    var = ((y - mu) ** 2).mean(-1, keepdims=True)
    return (y - mu) / jnp.sqrt(var + eps) * p["g"][0] + p["b"][0]


def _ref_mha(p, q, k, v, h, mask):
    lq, b, d = q.shape
    lk = k.shape[0]
    dh = d // h
    qp = _ref_linear(q.reshape(lq * b, d), p["wq"])
    kp = _ref_linear(k.reshape(lk * b, d), p["wk"])
    vp = _ref_linear(v.reshape(lk * b, d), p["wv"])
    sp = lambda x, L: x.reshape(L, b, h, dh).transpose(1, 2, 0, 3).reshape(b * h, L, dh)
    qh, kh, vh = sp(qp, lq), sp(kp, lk), sp(vp, lk)
    if mask is None:
        mask = jnp.zeros((lq, lk), jnp.float32)
    s = jnp.einsum("bqd,bkd->bqk", qh, kh, precision=_HIGH) / math.sqrt(dh) + mask[None]
    w = jax.nn.softmax(s, axis=-1)
    oh = jnp.einsum("bqk,bkd->bqd", w, vh, precision=_HIGH)
    o = oh.reshape(b, h, lq, dh).transpose(2, 0, 1, 3).reshape(lq * b, d)
    return _ref_linear(o, p["wo"]).reshape(lq, b, d)


def _ref_ffn(p, x):
    shape = x.shape
    x2 = x.reshape(-1, shape[-1])
    y = _ref_linear(_ref_linear(x2, p["fc1"], act="relu"), p["fc2"])
    return _ref_ln(p["ln"], y + x2).reshape(shape)


def _ref_encoder(p, x, h, mask):
    d = x.shape[-1]
    for lp in p["layers"]:
        a = _ref_mha(lp["attn"], x, x, x, h, mask)
        x = _ref_ln(lp["ln"], (a + x).reshape(-1, d)).reshape(x.shape)
        x = _ref_ffn(lp["ffn"], x)
    return _ref_ln(p["ln"], x.reshape(-1, d)).reshape(x.shape)


def _ref_head(x3, lin):
    y = _rdot(x3.mean(axis=1), lin["w"]) + lin["b"][0]
    return jax.nn.log_softmax(y, axis=-1)


def ref_full_seq2seq(params, src_tok, tgt, pe, h, src_mask, tgt_mask, mem_mask):
    pe_enc = params["encoder"]
    s, _ = src_tok.shape
    d = pe_enc["emb"].shape[1]
    x = jnp.take(pe_enc["emb"], src_tok, axis=0) * math.sqrt(d) + pe[:s][:, None, :]
    enc = _ref_encoder(pe_enc["enc"], x, h, src_mask)
    mem2 = _ref_head(enc, pe_enc["fc_out"])
    b = tgt.shape[1]
    memory = jnp.broadcast_to(mem2[:, None, :], (mem2.shape[0], b, mem2.shape[1]))
    for lp in params["decoder"]["layers"]:
        t2 = _ref_mha(lp["self_attn"], tgt, tgt, tgt, h, tgt_mask)
        tgt = _ref_ln(lp["ln"], (tgt + t2).reshape(-1, d)).reshape(tgt.shape)
        t2 = _ref_mha(lp["cross_attn"], tgt, memory, memory, h, mem_mask)
        tgt = _ref_ln(lp["ln"], (tgt + t2).reshape(-1, d)).reshape(tgt.shape)
        tgt = _ref_ffn(lp["ffn"], tgt)
    dec = _ref_ln(params["decoder"]["ln"], tgt.reshape(-1, d)).reshape(tgt.shape)
    return _ref_head(dec, params["fc_out"])


# ---------------------------------------------------------------------------
# Demo / self-test
# ---------------------------------------------------------------------------
if __name__ == "__main__":
    INPUT_DIM, OUTPUT_DIM = 64, 16
    MODEL_DIM, NUM_HEADS, FF_DIM, NUM_LAYERS = 32, 4, 64, 2
    S_SRC, T_TGT, BATCH = 8, 8, 2

    root = jax.random.PRNGKey(0)
    k_params, k_src, k_tgt = jax.random.split(root, 3)
    params = init_full_model(k_params, INPUT_DIM, OUTPUT_DIM, MODEL_DIM, FF_DIM,
                             NUM_LAYERS)
    pe_table = make_positional_encoding_table(MODEL_DIM, max_len=10000)

    src = jax.random.randint(k_src, (S_SRC, BATCH), 0, INPUT_DIM, dtype=jnp.int32)
    tgt = jax.random.normal(k_tgt, (T_TGT, BATCH, MODEL_DIM), dtype=jnp.float32)
    tgt_mask = causal_mask(T_TGT)

    # Quick unit check of the Pallas linear kernel.
    lin0 = params["encoder"]["enc"]["layers"][0]["attn"]["wq"]
    xt = jax.random.normal(jax.random.PRNGKey(1), (16, MODEL_DIM), jnp.float32)
    lin_ref = _rdot(xt, lin0["w"]) + lin0["b"][0]
    assert jnp.allclose(pallas_linear(xt, lin0), lin_ref, atol=2e-2, rtol=2e-2)

    fwd = jax.jit(full_seq2seq_fwd, static_argnames=("num_heads",))
    out = fwd(params, src, tgt, pe_table, None, tgt_mask, None,
              num_heads=NUM_HEADS)
    out = jax.block_until_ready(out)

    assert out.shape == (T_TGT, OUTPUT_DIM)
    assert bool(jnp.all(jnp.isfinite(out)))
    # log_softmax rows must exponentiate to probability distributions.
    assert bool(jnp.allclose(jnp.sum(jnp.exp(out), axis=-1), 1.0, atol=1e-4))

    ref = ref_full_seq2seq(params, src, tgt, pe_table, NUM_HEADS,
                           None, tgt_mask, None)
    max_err = float(jnp.max(jnp.abs(out - ref)))
    assert jnp.allclose(out, ref, atol=5e-2, rtol=5e-2), max_err

    print("KERNEL_OK")
</pallas_src>

<mosaic_0001>
module attributes {stable_mosaic.version = 11 : i64} {
  func.func @_linear_kernel(%arg0: i32, %arg1: memref<16x32xf32, #tpu.memory_space<vmem>>, %arg2: memref<32x32xf32, #tpu.memory_space<vmem>>, %arg3: memref<1x32xf32, #tpu.memory_space<vmem>>, %arg4: memref<16x32xf32, #tpu.memory_space<vmem>>) attributes {dimension_semantics = [#tpu.dimension_semantics<parallel>], iteration_bounds = array<i64: 1>, scalar_prefetch = 0 : i64, scratch_operands = 0 : i64, tpu.core_type = #tpu.core_type<tc>, window_params = [{transform_indices = @transform_0, window_bounds = array<i64: 16, 32>}, {pipeline_mode = #tpu.pipeline_mode<synchronous>, transform_indices = @transform_1, window_bounds = array<i64: 32, 32>}, {pipeline_mode = #tpu.pipeline_mode<synchronous>, transform_indices = @transform_2, window_bounds = array<i64: 1, 32>}, {transform_indices = @transform_3, window_bounds = array<i64: 16, 32>}]} {
    %c0 = arith.constant 0 : index
    %c0_0 = arith.constant 0 : index
    %0 = vector.load %arg1[%c0, %c0_0] : memref<16x32xf32, #tpu.memory_space<vmem>>, vector<16x32xf32>
    %c0_1 = arith.constant 0 : index
    %c0_2 = arith.constant 0 : index
    %1 = vector.load %arg2[%c0_1, %c0_2] : memref<32x32xf32, #tpu.memory_space<vmem>>, vector<32x32xf32>
    %cst = arith.constant dense<0.000000e+00> : vector<16x32xf32>
    %2 = tpu.matmul %0, %1, %cst {dimension_numbers = #tpu.dot_dimension_numbers<[1], [0], [0], [1], [0, 0, 1, 1], [], []>} : vector<16x32xf32>, vector<32x32xf32>, vector<16x32xf32> -> vector<16x32xf32>
    %c0_3 = arith.constant 0 : index
    %c0_4 = arith.constant 0 : index
    %3 = vector.load %arg3[%c0_3, %c0_4] : memref<1x32xf32, #tpu.memory_space<vmem>>, vector<1x32xf32>
    %4 = vector.broadcast %3 : vector<1x32xf32> to vector<16x32xf32>
    %5 = arith.addf %2, %4 : vector<16x32xf32>
    %c0_5 = arith.constant 0 : index
    %c0_6 = arith.constant 0 : index
    %6 = vector.load %arg4[%c0_5, %c0_6] : memref<16x32xf32, #tpu.memory_space<vmem>>, vector<16x32xf32>
    tpu.vector_store %arg4[%c0_5, %c0_6], %5 {strides = array<i32>} : memref<16x32xf32, #tpu.memory_space<vmem>>, vector<16x32xf32>,
    return
  }
  func.func @transform_0(%arg0: i32) -> (i32, i32) {
    %c0_i32 = arith.constant 0 : i32
    %c0_i32_0 = arith.constant 0 : i32
    return %arg0, %c0_i32 : i32, i32
  }
  func.func @transform_1(%arg0: i32) -> (i32, i32) {
    %c0_i32 = arith.constant 0 : i32
    %c0_i32_0 = arith.constant 0 : i32
    %c0_i32_1 = arith.constant 0 : i32
    return %c0_i32, %c0_i32_0 : i32, i32
  }
  func.func @transform_2(%arg0: i32) -> (i32, i32) {
    %c0_i32 = arith.constant 0 : i32
    %c0_i32_0 = arith.constant 0 : i32
    %c0_i32_1 = arith.constant 0 : i32
    return %c0_i32, %c0_i32_0 : i32, i32
  }
  func.func @transform_3(%arg0: i32) -> (i32, i32) {
    %c0_i32 = arith.constant 0 : i32
    %c0_i32_0 = arith.constant 0 : i32
    return %arg0, %c0_i32 : i32, i32
  }
}

</mosaic_0001>

<bundles_post_ra>
// kernel: tpu_custom_call.1
= control target key start
LH: loop header
LB: loop body
LE: loop exit
PB: predicated region body
PF: predicated region fallthrough
CT: control target
= control target key end

     0   :  { %8 = vsyncpa [#allocation3], 0  ;;  %s340_s0 = inlined_call_operand.hbm [shape: f32[16,32], index: 0, kind: input, shape index: {}]   ;;  %s341_s1 = inlined_call_operand.hbm [shape: f32[32,32], index: 1, kind: input, shape index: {}]   ;;  %s342_s2 = inlined_call_operand.vmem [shape: f32[1,32], index: 2, kind: input, shape index: {}]   ;;  %s343_s3 = inlined_call_operand.hbm [shape: f32[16,32], index: 3, kind: output, shape index: {}]  }
   0x1   :  { %9 = vsyncpa [#allocation6], 0 }
   0x2   :  { %10 = vsyncpa [#allocation4], 0  ;;  %s263_s12 = smov [#allocation2]   ;;  %s191_s16 = scalar_lea.hbm %s340_s0, 256 }
   0x3   :  { %s16_s13 = sshll.u32 %s263_s12, 4  ;;  %p192_p0 = scmp.ne.s32.totalorder %s340_s0, %s191_s16  ;;  %s17_s13 = int_to_ptr.vmem [resolvable:$true] %s16_s13 }
   0x4   :  { %p195_p1 = scmp.lt.u32.totalorder %s191_s16, %s340_s0 }
   0x6   :  { %p197_p2 = pnand %p195_p1, %p192_p0 }
   0x8   :  { %200 = shalt.err (!%p197_p2)
}
   0x9   :  { %s201_s21 = scalar_lea.vmem %s17_s13, 256  ;;  %p206_p4 = scmp.lt.s32.totalorder %s17_s13, %s17_s13 }
   0xa   :  { %p202_p3 = scmp.ne.s32.totalorder %s17_s13, %s201_s21  ;;  %p207_p5 = scmp.lt.s32.totalorder %s201_s21, %s201_s21 }
   0xc   :  { %p208_p6 = por %p207_p5, %p206_p4 }
   0xe   :  { %p209_p7 = pnand %p208_p6, %p202_p3 }
  0x10   :  { %212 = shalt.err (!%p209_p7)
}
  0x11   :  { %s264_s22 = smov 128   ;;  %s265_s23 = smov 8  }
  0x12   :  { %22 = dma.hbm_to_vmem [thread:$0]  %s340_s0, 256, %s17_s13, [#allocation3], %s264_s22, %s264_s22, %s265_s23  }
  0x13   :  { %s266_s26 = smov [#allocation5]   ;;  %s213_s30 = scalar_lea.hbm %s341_s1, 512 }
  0x14   :  { %s28_s27 = sshll.u32 %s266_s26, 4  ;;  %p214_p8 = scmp.ne.s32.totalorder %s341_s1, %s213_s30  ;;  %s29_s27 = int_to_ptr.vmem [resolvable:$true] %s28_s27 }
  0x15   :  { %p217_p9 = scmp.lt.u32.totalorder %s213_s30, %s341_s1 }
  0x17   :  { %p219_p10 = pnand %p217_p9, %p214_p8 }
  0x19   :  { %222 = shalt.err (!%p219_p10)
}
  0x1a   :  { %s223_s8 = scalar_lea.vmem %s29_s27, 512  ;;  %p228_p12 = scmp.lt.s32.totalorder %s29_s27, %s29_s27 }
  0x1b   :  { %p224_p11 = scmp.ne.s32.totalorder %s29_s27, %s223_s8  ;;  %p229_p13 = scmp.lt.s32.totalorder %s223_s8, %s223_s8 }
  0x1d   :  { %p230_p0 = por %p229_p13, %p228_p12 }
  0x1f   :  { %p231_p1 = pnand %p230_p0, %p224_p11 }
  0x21   :  { %234 = shalt.err (!%p231_p1)
}
  0x22   :  { %34 = dma.hbm_to_vmem [thread:$0]  %s341_s1, 512, %s29_s27, [#allocation6], %s264_s22, %s264_s22, %s265_s23  }
  0x23   :  { %257 = dma.done.wait [#allocation3], 256  }
  0x24   :  { %258 = vsyncadd [#allocation3], 4294967040 }
  0x25   :  { %259 = dma.done.wait [#allocation6], 512  }
  0x26   :  { %260 = vsyncadd [#allocation6], 4294966784  ;;  %vm56_vm0 = vcmask 261120   ;;  %v45_v0 = vld [vmem:[#allocation5] sm:$0xff]  ;;  %v46_v1 = vld [vmem:[#allocation5 + $0x8] sm:$0xff]  ;;  %s267_s11 = smov [#allocation7]  }
  0x27   :  { %v47_v2 = vld [vmem:[#allocation5 + $0x10] sm:$0xff]  ;;  %v178_v3 = vpack.c.bf16 %v46_v1, %v45_v0  ;;  %v48_v4 = vld [vmem:[#allocation5 + $0x18] sm:$0xff]  ;;  %s145_s12 = sshll.u32 %s267_s11, 4  ;;  %s146_s12 = int_to_ptr.vmem [resolvable:$true] %s145_s12 }
  0x28   :  { %v43_v5 = vld [vmem:[#allocation2] sm:$0xff]  ;;  %v182_v6 = vpack.c.bf16 %v48_v4, %v47_v2  ;;  %v44_v7 = vld [vmem:[#allocation2 + $0x8] sm:$0xff]  ;;  %s235_s13 = scalar_lea.vmem %s146_s12, 256  ;;  %p240_p3 = scmp.lt.s32.totalorder %s146_s12, %s146_s12 }
  0x29   :  { %175 = vmatprep.mubr.msk.f32.mxu0 %vm56_vm0, %v43_v5  ;;  %179 = vmatprep.subr.bf16.mxu0 %v178_v3  ;;  %v158_v8 = vld [vmem:[%s342_s2] ss:$0 sm:$0xff]  ;;  %p236_p2 = scmp.ne.s32.totalorder %s146_s12, %s235_s13  ;;  %p241_p4 = scmp.lt.s32.totalorder %s235_s13, %s235_s13 }
  0x2a   :  { %181 = vmatpush3.bf16.msra.mxu0 %v178_v3 }
  0x2b   :  { %183 = vmatprep.subr.bf16.mxu0 %v182_v6  ;;  %p242_p5 = por %p241_p4, %p240_p3 }
  0x2d   :  { %p243_p6 = pnand %p242_p5, %p236_p2 }
  0x2e   :  { %185 = vmatpush3.bf16.msra.mxu0 %v182_v6 }
  0x31   :  { %176 = vmatmul.mubr.msk.f32.vlgmr.msra.gmra.mrb[0].mxu0 %vm56_vm0, %v44_v7 }
 0x104   :  { %v177_v9 = vpop.f32.mrb[0].mxu0 }
 0x105   :  { %v135_v10 = vadd.f32 %v177_v9, %v158_v8  ;;  %v129_v11 = vpop.f32.mrb[1].mxu0 }
 0x106   :  { %v130_v12 = vadd.f32 %v158_v8, %v129_v11 }
 0x107   :  { %139 = vst.msk [vmem:[#allocation7 + $0x8] sm:$0xff] %vm56_vm0, %v135_v10 }
 0x108   :  { %138 = vst.msk [vmem:[#allocation7] sm:$0xff] %vm56_vm0, %v130_v12 }
 0x109   :  { %246 = shalt.err (!%p243_p6)
}
 0x10a   :  { %s247_s15 = scalar_lea.hbm %s343_s3, 256 }
 0x10b   :  { %p248_p7 = scmp.ne.s32.totalorder %s343_s3, %s247_s15  ;;  %p251_p8 = scmp.lt.u32.totalorder %s247_s15, %s343_s3 }
 0x10d   :  { %p253_p9 = pnand %p251_p8, %p248_p7 }
 0x10f   :  { %256 = shalt.err (!%p253_p9)
}
 0x110   :  { %151 = dma.vmem_to_hbm [thread:$0]  %s146_s12, 256, %s343_s3, [#allocation4], %s264_s22, %s264_s22, %s265_s23  }
 0x111   :  { %261 = dma.done.wait [#allocation4], 256  }
 0x112   :  { %262 = vsyncadd [#allocation4], 4294967040 }
 0x113   :  { %155 = vsyncpa [#allocation3], 1 }
 0x114   :  { %156 = vsyncpa [#allocation6], 1 }
 0x115   :  { %157 = vsyncpa [#allocation4], 1 }

</bundles_post_ra>
